<compile_context>
chip_gen: v6e
topology: v6e:2x2x1
jax: 0.10.0
libtpu: 0.0.40
codegen_flags: <defaults>
</compile_context>

<pallas_src>
import math
import numpy as np

import jax
import jax.numpy as jnp
from jax import lax
from jax.experimental import pallas as pl
from jax.experimental.pallas import tpu as pltpu


# ----------------------------------------------------------------------------
# Host-side parameter construction (mirrors GaussianBlur.create_gaussian_kernel)
# ----------------------------------------------------------------------------
def gaussian_kern1d(kernlen: int = 21, nsig: float = 3.0) -> np.ndarray:
    interval = (2.0 * nsig + 1.0) / kernlen
    xs = np.linspace(-nsig - interval / 2.0, nsig + interval / 2.0, kernlen + 1)
    # scipy.stats.norm.cdf(x) == 0.5 * (1 + erf(x / sqrt(2)))
    cdf = np.array([0.5 * (1.0 + math.erf(v / math.sqrt(2.0))) for v in xs],
                   dtype=np.float64)
    return np.diff(cdf)                       # (kernlen,), positive, symmetric


def gaussian_taps_1d(kernlen: int = 21, nsig: float = 3.0) -> np.ndarray:
    # kernel_2d = sqrt(outer(k1d,k1d)) / sum(...) == outer(t, t) exactly.
    s = np.sqrt(gaussian_kern1d(kernlen, nsig))
    return s / s.sum()                        # float64 1-D taps


def build_band_matrix(n: int, taps: np.ndarray) -> np.ndarray:
    # band[r, c] = taps[r - c + pad]  (zero "same" padding folded into the band).
    # Symmetric, because the taps are symmetric.
    kernlen = taps.shape[0]
    pad = kernlen // 2
    idx = np.arange(n)
    k = idx[:, None] - idx[None, :] + pad
    valid = (k >= 0) & (k < kernlen)
    return np.where(valid, taps[np.clip(k, 0, kernlen - 1)], 0.0)   # float64 (n, n)


def create_gaussian_kernel_2d(kernlen: int = 21, nsig: float = 3.0) -> np.ndarray:
    k1d = gaussian_kern1d(kernlen, nsig)
    kernel_raw = np.sqrt(np.outer(k1d, k1d))
    return (kernel_raw / kernel_raw.sum()).astype(np.float32)


# ----------------------------------------------------------------------------
# Pallas kernels
# ----------------------------------------------------------------------------
def _blur_fused_kernel(m_ref, x_ref, o_ref):
    # m_ref : VMEM (H*W, H*W) fused blur matrix (resident across grid steps)
    # x_ref : VMEM (Bc, H*W)  block of flattened channel images
    # o_ref : VMEM (Bc, H*W)  output block (lane-dense stores)
    o_ref[...] = jnp.dot(x_ref[...], m_ref[...],
                         preferred_element_type=jnp.float32).astype(o_ref.dtype)


def _blur_separable_kernel(bw_ref, bh_ref, x_ref, o_ref):
    # bw_ref : VMEM (W, W) width-pass band matrix  (resident across grid steps)
    # bh_ref : VMEM (H, H) height-pass band matrix (symmetric, resident)
    # x_ref  : VMEM (Bc, H, W) block of channel images
    # o_ref  : VMEM (Bc, H, W) output block
    Bc, H, W = x_ref.shape
    x = x_ref[...]

    # Width pass: fold (Bc, H) into the matmul M dimension.
    y = jnp.dot(x.reshape(Bc * H, W), bw_ref[...],
                preferred_element_type=jnp.float32)                    # (Bc*H, W)

    # Height pass on transposed images:  out[b]^T = y[b]^T @ A^T (A symmetric).
    yt = jnp.transpose(y.reshape(Bc, H, W), (0, 2, 1)).reshape(Bc * W, H)
    zt = jnp.dot(yt, bh_ref[...], preferred_element_type=jnp.float32)  # (Bc*W, H)
    z = jnp.transpose(zt.reshape(Bc, W, H), (0, 2, 1))                 # (Bc, H, W)

    o_ref[...] = z.astype(o_ref.dtype)


# ----------------------------------------------------------------------------
# Wrapper
# ----------------------------------------------------------------------------
_FUSED_MAX_PIXELS = 1024     # (H*W)^2 * 4B <= 4 MiB resident -> use fused path


def _pick_block_channels(NC: int, bytes_per_img: int, max_block_bytes: int) -> int:
    bc = max(1, min(NC, max_block_bytes // max(bytes_per_img, 1)))
    if bc >= NC:
        # Everything fits in one step.  Split in two only when both halves stay
        # fat and sublane-aligned, so the "parallel" axis can shard on v7x.
        if NC >= 16 and NC % 2 == 0:
            return NC // 2
        return NC
    if bc >= 8:
        bc = (bc // 8) * 8   # keep blocks sublane-aligned
    return bc


def gaussian_blur(x: jax.Array, *, kernlen: int = 21, nsig: float = 3.0,
                  max_block_bytes: int = 4 << 20,
                  vmem_limit_bytes: int = 48 * 1024 * 1024,
                  force_path: str | None = None) -> jax.Array:
    """Depthwise Gaussian blur of x: (N, C, H, W), same semantics as the module."""
    N, C, H, W = x.shape
    NC = N * C
    taps = gaussian_taps_1d(kernlen, nsig)
    band_h = build_band_matrix(H, taps)       # (H, H) float64
    band_w = build_band_matrix(W, taps)       # (W, W) float64

    path = force_path
    if path is None:
        path = "fused" if H * W <= _FUSED_MAX_PIXELS else "separable"

    if path == "fused":
        HW = H * W
        # out_flat = x_flat @ kron(band_h, band_w)   (bands are symmetric)
        m = jnp.asarray(np.kron(band_h, band_w).astype(np.float32))    # (HW, HW)
        x2 = x.reshape(NC, HW)                 # free metadata reshape in HBM

        bytes_per_img = HW * x.dtype.itemsize
        bc = _pick_block_channels(NC, bytes_per_img, max_block_bytes)
        grid = (pl.cdiv(NC, bc),)

        out2 = pl.pallas_call(
            _blur_fused_kernel,
            out_shape=jax.ShapeDtypeStruct((NC, HW), x.dtype),
            grid_spec=pltpu.PrefetchScalarGridSpec(
                num_scalar_prefetch=0,
                grid=grid,
                in_specs=[
                    # Fused matrix: same block every step -> resident in VMEM.
                    pl.BlockSpec((HW, HW), lambda i: (0, 0)),
                    pl.BlockSpec((bc, HW), lambda i: (i, 0)),
                ],
                out_specs=pl.BlockSpec((bc, HW), lambda i: (i, 0)),
            ),
            compiler_params=pltpu.CompilerParams(
                dimension_semantics=("parallel",),
                vmem_limit_bytes=vmem_limit_bytes),
        )(m, x2)
        return out2.reshape(N, C, H, W)

    # ---- separable path (large images) ----
    bw = jnp.asarray(band_w.astype(np.float32))
    bh = jnp.asarray(band_h.astype(np.float32))
    x3 = x.reshape(NC, H, W)

    bytes_per_img = H * W * x.dtype.itemsize
    bc = _pick_block_channels(NC, bytes_per_img, max_block_bytes)
    grid = (pl.cdiv(NC, bc),)

    out3 = pl.pallas_call(
        _blur_separable_kernel,
        out_shape=jax.ShapeDtypeStruct((NC, H, W), x.dtype),
        grid_spec=pltpu.PrefetchScalarGridSpec(
            num_scalar_prefetch=0,
            grid=grid,
            in_specs=[
                # Band matrices: same block every step -> resident in VMEM.
                pl.BlockSpec((W, W), lambda i: (0, 0)),
                pl.BlockSpec((H, H), lambda i: (0, 0)),
                pl.BlockSpec((bc, H, W), lambda i: (i, 0, 0)),
            ],
            out_specs=pl.BlockSpec((bc, H, W), lambda i: (i, 0, 0)),
        ),
        compiler_params=pltpu.CompilerParams(
            dimension_semantics=("parallel",),
            vmem_limit_bytes=vmem_limit_bytes),
    )(bw, bh, x3)
    return out3.reshape(N, C, H, W)


# ----------------------------------------------------------------------------
# Reference (plain JAX depthwise conv with the original 2D kernel) for validation
# ----------------------------------------------------------------------------
def gaussian_blur_ref(x, kernlen=21, nsig=3.0):
    C = x.shape[1]
    k2d = create_gaussian_kernel_2d(kernlen, nsig)
    w = jnp.asarray(np.repeat(k2d[None, None, :, :], C, axis=0))   # (C,1,KL,KL)
    return lax.conv_general_dilated(
        x, w, window_strides=(1, 1),
        padding=[(kernlen // 2, kernlen // 2)] * 2,
        dimension_numbers=("NCHW", "OIHW", "NCHW"),
        feature_group_count=C)


if __name__ == "__main__":
    N, C, H, W = 2, 4, 16, 16
    KERNLEN, NSIG = 21, 3.0

    key = jax.random.PRNGKey(0)
    x = jax.random.normal(key, (N, C, H, W), dtype=jnp.float32)

    ref = jax.block_until_ready(gaussian_blur_ref(x, KERNLEN, NSIG))

    # Fused single-matmul path (auto-selected at this image size).
    out_fused = jax.block_until_ready(gaussian_blur(x, kernlen=KERNLEN, nsig=NSIG))
    np.testing.assert_allclose(np.asarray(out_fused), np.asarray(ref),
                               rtol=1e-4, atol=1e-5)

    # Separable two-matmul path (used for larger images) — validate it as well.
    out_sep = jax.block_until_ready(
        gaussian_blur(x, kernlen=KERNLEN, nsig=NSIG, force_path="separable"))
    np.testing.assert_allclose(np.asarray(out_sep), np.asarray(ref),
                               rtol=1e-4, atol=1e-5)

    print("KERNEL_OK")
</pallas_src>

<mosaic_0001>
module attributes {stable_mosaic.version = 11 : i64} {
  func.func @_blur_fused_kernel(%arg0: i32, %arg1: memref<256x256xf32, #tpu.memory_space<vmem>>, %arg2: memref<8x256xf32, #tpu.memory_space<vmem>>, %arg3: memref<8x256xf32, #tpu.memory_space<vmem>>) attributes {dimension_semantics = [#tpu.dimension_semantics<parallel>], iteration_bounds = array<i64: 1>, scalar_prefetch = 0 : i64, scratch_operands = 0 : i64, tpu.core_type = #tpu.core_type<tc>, window_params = [{pipeline_mode = #tpu.pipeline_mode<synchronous>, transform_indices = @transform_0, window_bounds = array<i64: 256, 256>}, {transform_indices = @transform_1, window_bounds = array<i64: 8, 256>}, {transform_indices = @transform_2, window_bounds = array<i64: 8, 256>}]} {
    %c0 = arith.constant 0 : index
    %c0_0 = arith.constant 0 : index
    %0 = vector.load %arg2[%c0, %c0_0] : memref<8x256xf32, #tpu.memory_space<vmem>>, vector<8x256xf32>
    %c0_1 = arith.constant 0 : index
    %c0_2 = arith.constant 0 : index
    %1 = vector.load %arg1[%c0_1, %c0_2] : memref<256x256xf32, #tpu.memory_space<vmem>>, vector<256x256xf32>
    %cst = arith.constant dense<0.000000e+00> : vector<8x256xf32>
    %2 = tpu.matmul %0, %1, %cst {dimension_numbers = #tpu.dot_dimension_numbers<[1], [0], [0], [1], [0, 0, 1, 1], [], []>} : vector<8x256xf32>, vector<256x256xf32>, vector<8x256xf32> -> vector<8x256xf32>
    %c0_3 = arith.constant 0 : index
    %c0_4 = arith.constant 0 : index
    %3 = vector.load %arg3[%c0_3, %c0_4] : memref<8x256xf32, #tpu.memory_space<vmem>>, vector<8x256xf32>
    tpu.vector_store %arg3[%c0_3, %c0_4], %2 {strides = array<i32>} : memref<8x256xf32, #tpu.memory_space<vmem>>, vector<8x256xf32>,
    return
  }
  func.func @transform_0(%arg0: i32) -> (i32, i32) {
    %c0_i32 = arith.constant 0 : i32
    %c0_i32_0 = arith.constant 0 : i32
    %c0_i32_1 = arith.constant 0 : i32
    return %c0_i32, %c0_i32_0 : i32, i32
  }
  func.func @transform_1(%arg0: i32) -> (i32, i32) {
    %c0_i32 = arith.constant 0 : i32
    %c0_i32_0 = arith.constant 0 : i32
    return %arg0, %c0_i32 : i32, i32
  }
  func.func @transform_2(%arg0: i32) -> (i32, i32) {
    %c0_i32 = arith.constant 0 : i32
    %c0_i32_0 = arith.constant 0 : i32
    return %arg0, %c0_i32 : i32, i32
  }
}

</mosaic_0001>

<bundles_post_ra>
// kernel: tpu_custom_call.1
= control target key start
LH: loop header
LB: loop body
LE: loop exit
PB: predicated region body
PF: predicated region fallthrough
CT: control target
= control target key end

     0   :  { %7 = vsyncpa [#allocation3], 0  ;;  %s293_s0 = inlined_call_operand.hbm [shape: f32[256,256], index: 0, kind: input, shape index: {}]   ;;  %s294_s1 = inlined_call_operand.hbm [shape: f32[8,256], index: 1, kind: input, shape index: {}]   ;;  %s295_s2 = inlined_call_operand.hbm [shape: f32[8,256], index: 2, kind: output, shape index: {}]  }
   0x1   :  { %8 = vsyncpa [#allocation6], 0 }
   0x2   :  { %9 = vsyncpa [#allocation4], 0  ;;  %s264_s9 = smov [#allocation2]  }
   0x3   :  { %s15_s10 = sshll.u32 %s264_s9, 4  ;;  %s16_s10 = int_to_ptr.vmem [resolvable:$true] %s15_s10 }
   0x4   :  { %s206_s11 = scalar_lea.vmem %s16_s10, 8192  ;;  %p211_p1 = scmp.lt.s32.totalorder %s16_s10, %s16_s10 }
   0x5   :  { %p207_p0 = scmp.ne.s32.totalorder %s16_s10, %s206_s11  ;;  %p212_p2 = scmp.lt.s32.totalorder %s206_s11, %s206_s11 }
   0x7   :  { %p213_p3 = por %p212_p2, %p211_p1 }
   0x9   :  { %p214_p4 = pnand %p213_p3, %p207_p0 }
   0xb   :  { %217 = shalt.err (!%p214_p4)
}
   0xc   :  { %s265_s12 = smov 256   ;;  %s266_s13 = smov 16  }
   0xd   :  { %21 = dma.hbm_to_vmem [thread:$0]  %s293_s0, 8192, %s16_s10, [#allocation3], %s265_s12, %s265_s12, %s266_s13  }
   0xe   :  { %s267_s16 = smov [#allocation5]  }
   0xf   :  { %s28_s17 = sshll.u32 %s267_s16, 4  ;;  %s29_s17 = int_to_ptr.vmem [resolvable:$true] %s28_s17 }
  0x10   :  { %s226_s18 = scalar_lea.vmem %s29_s17, 256  ;;  %p231_p6 = scmp.lt.s32.totalorder %s29_s17, %s29_s17 }
  0x11   :  { %p227_p5 = scmp.ne.s32.totalorder %s29_s17, %s226_s18  ;;  %p232_p7 = scmp.lt.s32.totalorder %s226_s18, %s226_s18 }
  0x13   :  { %p233_p8 = por %p232_p7, %p231_p6 }
  0x15   :  { %p234_p9 = pnand %p233_p8, %p227_p5 }
  0x17   :  { %237 = shalt.err (!%p234_p9)
}
  0x18   :  { %31 = dma.hbm_to_vmem [thread:$0]  %s294_s1, 256, %s29_s17, [#allocation6]  }
  0x19   :  { %258 = dma.done.wait [#allocation3], 8192  }
  0x1a   :  { %259 = vsyncadd [#allocation3], 4294959104 }
  0x1b   :  { %260 = dma.done.wait [#allocation6], 256  }
  0x1c   :  { %261 = vsyncadd [#allocation6], 4294967040  ;;  %v71_v0 = vld [vmem:[#allocation2 + $0xf8] sm:$0xff]  ;;  %v70_v1 = vld [vmem:[#allocation2 + $0xf0] sm:$0xff]  ;;  %s268_s0 = smov [#allocation7]  }
  0x1d   :  { %v69_v2 = vld [vmem:[#allocation2 + $0xe8] sm:$0xff]  ;;  %104 = vmatprep.subr.mxu0 %v71_v0  ;;  %v68_v3 = vld [vmem:[#allocation2 + $0xe0] sm:$0xff]  ;;  %v67_v4 = vld [vmem:[#allocation2 + $0xd8] sm:$0xff]  ;;  %s183_s1 = sshll.u32 %s268_s0, 4  ;;  %s184_s1 = int_to_ptr.vmem [resolvable:$true] %s183_s1 }
  0x1e   :  { %105 = vmatpush1.msra.mxu0 %v70_v1  ;;  %v66_v5 = vld [vmem:[#allocation2 + $0xd0] sm:$0xff]  ;;  %v65_v6 = vld [vmem:[#allocation2 + $0xc8] sm:$0xff]  ;;  %v64_v7 = vld [vmem:[#allocation2 + $0xc0] sm:$0xff]  ;;  %s238_s21 = scalar_lea.vmem %s184_s1, 256  ;;  %p243_p11 = scmp.lt.s32.totalorder %s184_s1, %s184_s1 }
  0x1f   :  { %106 = vmatprep.subr.mxu0 %v69_v2  ;;  %v63_v8 = vld [vmem:[#allocation2 + $0xb8] sm:$0xff]  ;;  %v62_v9 = vld [vmem:[#allocation2 + $0xb0] sm:$0xff]  ;;  %v61_v10 = vld [vmem:[#allocation2 + $0xa8] sm:$0xff]  ;;  %p239_p10 = scmp.ne.s32.totalorder %s184_s1, %s238_s21  ;;  %p244_p12 = scmp.lt.s32.totalorder %s238_s21, %s238_s21 }
  0x20   :  { %107 = vmatpush1.msra.mxu0 %v68_v3  ;;  %v60_v11 = vld [vmem:[#allocation2 + $0xa0] sm:$0xff]  ;;  %v59_v12 = vld [vmem:[#allocation2 + $0x98] sm:$0xff]  ;;  %v58_v13 = vld [vmem:[#allocation2 + $0x90] sm:$0xff] }
  0x21   :  { %108 = vmatprep.subr.mxu0 %v67_v4  ;;  %v57_v14 = vld [vmem:[#allocation2 + $0x88] sm:$0xff]  ;;  %v56_v15 = vld [vmem:[#allocation2 + $0x80] sm:$0xff]  ;;  %v55_v16 = vld [vmem:[#allocation2 + $0x78] sm:$0xff]  ;;  %p245_p13 = por %p244_p12, %p243_p11 }
  0x22   :  { %109 = vmatpush1.msra.mxu0 %v66_v5  ;;  %v54_v17 = vld [vmem:[#allocation2 + $0x70] sm:$0xff]  ;;  %v53_v18 = vld [vmem:[#allocation2 + $0x68] sm:$0xff]  ;;  %v52_v19 = vld [vmem:[#allocation2 + $0x60] sm:$0xff] }
  0x23   :  { %110 = vmatprep.subr.mxu0 %v65_v6  ;;  %v51_v20 = vld [vmem:[#allocation2 + $0x58] sm:$0xff]  ;;  %v50_v21 = vld [vmem:[#allocation2 + $0x50] sm:$0xff]  ;;  %v49_v22 = vld [vmem:[#allocation2 + $0x48] sm:$0xff]  ;;  %p246_p0 = pnand %p245_p13, %p239_p10 }
  0x24   :  { %111 = vmatpush1.msra.mxu0 %v64_v7  ;;  %v48_v23 = vld [vmem:[#allocation2 + $0x40] sm:$0xff]  ;;  %v39_v24 = vld [vmem:[#allocation5 + $0x8] sm:$0xff]  ;;  %v47_v25 = vld [vmem:[#allocation2 + $0x38] sm:$0xff] }
  0x25   :  { %112 = vmatprep.subr.mxu0 %v63_v8  ;;  %168 = vmatprep.mubr.f32.mxu0 %v39_v24  ;;  %v46_v26 = vld [vmem:[#allocation2 + $0x30] sm:$0xff]  ;;  %v45_v27 = vld [vmem:[#allocation2 + $0x28] sm:$0xff]  ;;  %v44_v28 = vld [vmem:[#allocation2 + $0x20] sm:$0xff] }
  0x26   :  { %113 = vmatpush1.msra.mxu0 %v62_v9  ;;  %v43_v29 = vld [vmem:[#allocation2 + $0x18] sm:$0xff]  ;;  %v42_v30 = vld [vmem:[#allocation2 + $0x10] sm:$0xff]  ;;  %v41_v31 = vld [vmem:[#allocation2 + $0x8] sm:$0xff] }
  0x27   :  { %114 = vmatprep.subr.mxu0 %v61_v10  ;;  %v40_v32 = vld [vmem:[#allocation2] sm:$0xff]  ;;  %v103_v33 = vld [vmem:[#allocation2 + $0x1f8] sm:$0xff]  ;;  %v102_v34 = vld [vmem:[#allocation2 + $0x1f0] sm:$0xff] }
  0x28   :  { %115 = vmatpush1.msra.mxu0 %v60_v11  ;;  %v101_v35 = vld [vmem:[#allocation2 + $0x1e8] sm:$0xff]  ;;  %v100_v36 = vld [vmem:[#allocation2 + $0x1e0] sm:$0xff]  ;;  %v99_v37 = vld [vmem:[#allocation2 + $0x1d8] sm:$0xff] }
  0x29   :  { %116 = vmatprep.subr.mxu0 %v59_v12  ;;  %v98_v38 = vld [vmem:[#allocation2 + $0x1d0] sm:$0xff]  ;;  %v97_v39 = vld [vmem:[#allocation2 + $0x1c8] sm:$0xff]  ;;  %v96_v40 = vld [vmem:[#allocation2 + $0x1c0] sm:$0xff] }
  0x2a   :  { %117 = vmatpush1.msra.mxu0 %v58_v13  ;;  %v95_v41 = vld [vmem:[#allocation2 + $0x1b8] sm:$0xff]  ;;  %v94_v42 = vld [vmem:[#allocation2 + $0x1b0] sm:$0xff]  ;;  %v93_v43 = vld [vmem:[#allocation2 + $0x1a8] sm:$0xff] }
  0x2b   :  { %118 = vmatprep.subr.mxu0 %v57_v14  ;;  %v92_v44 = vld [vmem:[#allocation2 + $0x1a0] sm:$0xff]  ;;  %v91_v45 = vld [vmem:[#allocation2 + $0x198] sm:$0xff]  ;;  %v90_v46 = vld [vmem:[#allocation2 + $0x190] sm:$0xff] }
  0x2c   :  { %119 = vmatpush1.msra.mxu0 %v56_v15  ;;  %v89_v47 = vld [vmem:[#allocation2 + $0x188] sm:$0xff]  ;;  %v88_v48 = vld [vmem:[#allocation2 + $0x180] sm:$0xff]  ;;  %v87_v49 = vld [vmem:[#allocation2 + $0x178] sm:$0xff] }
  0x2d   :  { %120 = vmatprep.subr.mxu0 %v55_v16  ;;  %v86_v50 = vld [vmem:[#allocation2 + $0x170] sm:$0xff]  ;;  %v85_v51 = vld [vmem:[#allocation2 + $0x168] sm:$0xff]  ;;  %v84_v52 = vld [vmem:[#allocation2 + $0x160] sm:$0xff] }
  0x2e   :  { %121 = vmatpush1.msra.mxu0 %v54_v17  ;;  %v83_v53 = vld [vmem:[#allocation2 + $0x158] sm:$0xff]  ;;  %v82_v54 = vld [vmem:[#allocation2 + $0x150] sm:$0xff]  ;;  %v81_v55 = vld [vmem:[#allocation2 + $0x148] sm:$0xff] }
  0x2f   :  { %122 = vmatprep.subr.mxu0 %v53_v18  ;;  %v80_v56 = vld [vmem:[#allocation2 + $0x140] sm:$0xff]  ;;  %v79_v57 = vld [vmem:[#allocation2 + $0x138] sm:$0xff]  ;;  %v78_v58 = vld [vmem:[#allocation2 + $0x130] sm:$0xff] }
  0x30   :  { %123 = vmatpush1.msra.mxu0 %v52_v19  ;;  %v77_v59 = vld [vmem:[#allocation2 + $0x128] sm:$0xff]  ;;  %v76_v60 = vld [vmem:[#allocation2 + $0x120] sm:$0xff]  ;;  %v75_v61 = vld [vmem:[#allocation2 + $0x118] sm:$0xff] }
  0x31   :  { %124 = vmatprep.subr.mxu0 %v51_v20  ;;  %v74_v62 = vld [vmem:[#allocation2 + $0x110] sm:$0xff]  ;;  %v73_v63 = vld [vmem:[#allocation2 + $0x108] sm:$0xff]  ;;  %v72_v0 = vld [vmem:[#allocation2 + $0x100] sm:$0xff] }
  0x32   :  { %125 = vmatpush1.msra.mxu0 %v50_v21  ;;  %v38_v1 = vld [vmem:[#allocation5] sm:$0xff] }
  0x33   :  { %126 = vmatprep.subr.mxu0 %v49_v22 }
  0x34   :  { %127 = vmatpush1.msra.mxu0 %v48_v23 }
  0x35   :  { %128 = vmatprep.subr.mxu0 %v47_v25 }
  0x36   :  { %129 = vmatpush1.msra.mxu0 %v46_v26 }
  0x37   :  { %130 = vmatprep.subr.mxu0 %v45_v27 }
  0x38   :  { %131 = vmatpush1.msra.mxu0 %v44_v28 }
  0x39   :  { %132 = vmatprep.subr.mxu0 %v43_v29 }
  0x3a   :  { %133 = vmatpush1.msra.mxu0 %v42_v30 }
  0x3b   :  { %134 = vmatprep.subr.mxu0 %v41_v31 }
  0x3c   :  { %135 = vmatpush1.msra.mxu0 %v40_v32 }
  0x3d   :  { %136 = vmatprep.subr.mxu0 %v103_v33 }
  0x3e   :  { %137 = vmatpush2.msra.mxu0 %v102_v34 }
  0x3f   :  { %138 = vmatprep.subr.mxu0 %v101_v35 }
  0x40   :  { %139 = vmatpush2.msra.mxu0 %v100_v36 }
  0x41   :  { %140 = vmatprep.subr.mxu0 %v99_v37 }
  0x42   :  { %141 = vmatpush2.msra.mxu0 %v98_v38 }
  0x43   :  { %142 = vmatprep.subr.mxu0 %v97_v39 }
  0x44   :  { %143 = vmatpush2.msra.mxu0 %v96_v40 }
  0x45   :  { %144 = vmatprep.subr.mxu0 %v95_v41 }
  0x46   :  { %145 = vmatpush2.msra.mxu0 %v94_v42 }
  0x47   :  { %146 = vmatprep.subr.mxu0 %v93_v43 }
  0x48   :  { %147 = vmatpush2.msra.mxu0 %v92_v44 }
  0x49   :  { %148 = vmatprep.subr.mxu0 %v91_v45 }
  0x4a   :  { %149 = vmatpush2.msra.mxu0 %v90_v46 }
  0x4b   :  { %150 = vmatprep.subr.mxu0 %v89_v47 }
  0x4c   :  { %151 = vmatpush2.msra.mxu0 %v88_v48 }
  0x4d   :  { %152 = vmatprep.subr.mxu0 %v87_v49 }
  0x4e   :  { %153 = vmatpush2.msra.mxu0 %v86_v50 }
  0x4f   :  { %154 = vmatprep.subr.mxu0 %v85_v51 }
  0x50   :  { %155 = vmatpush2.msra.mxu0 %v84_v52 }
  0x51   :  { %156 = vmatprep.subr.mxu0 %v83_v53 }
  0x52   :  { %157 = vmatpush2.msra.mxu0 %v82_v54 }
  0x53   :  { %158 = vmatprep.subr.mxu0 %v81_v55 }
  0x54   :  { %159 = vmatpush2.msra.mxu0 %v80_v56 }
  0x55   :  { %160 = vmatprep.subr.mxu0 %v79_v57 }
  0x56   :  { %161 = vmatpush2.msra.mxu0 %v78_v58 }
  0x57   :  { %162 = vmatprep.subr.mxu0 %v77_v59 }
  0x58   :  { %163 = vmatpush2.msra.mxu0 %v76_v60 }
  0x59   :  { %164 = vmatprep.subr.mxu0 %v75_v61 }
  0x5a   :  { %165 = vmatpush2.msra.mxu0 %v74_v62 }
  0x5b   :  { %166 = vmatprep.subr.mxu0 %v73_v63 }
  0x5c   :  { %167 = vmatpush2.msra.mxu0 %v72_v0 }
  0x5d   :  { %169 = vmatmul.mubr.f32.vlgmr.msra.gmra.mxu0 %v38_v1 }
 0x11d   :  { %v170_v2 = vpop.f32.mrf.mxu0 }
 0x11e   :  { %175 = vst [vmem:[#allocation7] sm:$0xff] %v170_v2 }
 0x11f   :  { %v172_v3 = vpop.f32.mrf.mxu0 }
 0x120   :  { %176 = vst [vmem:[#allocation7 + $0x8] sm:$0xff] %v172_v3 }
 0x121   :  { %249 = shalt.err (!%p246_p0)
}
 0x122   :  { %186 = dma.vmem_to_hbm [thread:$0]  %s184_s1, 256, %s295_s2, [#allocation4]  }
 0x123   :  { %262 = dma.done.wait [#allocation4], 256  }
 0x124   :  { %263 = vsyncadd [#allocation4], 4294967040 }
 0x125   :  { %190 = vsyncpa [#allocation3], 1 }
 0x126   :  { %191 = vsyncpa [#allocation6], 1 }
 0x127   :  { %192 = vsyncpa [#allocation4], 1 }

</bundles_post_ra>
